<compile_context>
chip_gen: v6e
topology: v6e:2x2x1
jax: 0.10.0
libtpu: 0.0.40
codegen_flags: <defaults>
</compile_context>

<pallas_src>
import functools
import math

import jax
import jax.numpy as jnp
from jax import lax
from jax.experimental import pallas as pl
from jax.experimental.pallas import tpu as pltpu

LANES = 128
SUBLANES = 8
CHUNK_ROWS = 32                    # multiple of native sublane tiling for f32/bf16/int8
BLOCK_BYTES = 2 * 1024 * 1024      # per-input per-step HBM tile
FAST_PATH_BYTES = 256 * 1024       # below this total size, fused XLA reduction wins


def _round_up(a, m):
    return -(-a // m) * m


def _round_down(a, m):
    return (a // m) * m


def _unroll_for(n):
    return max(1, math.gcd(4, n))


def _partial_sums_kernel(*refs, n_in, n_chunks, unroll, tail_rows, tail_chunks,
                         tail_unroll):
    """Raw per-block sums of `n_in` equally shaped (rows, 128) inputs.

    Writes one (n_in, 8, 128) f32 partial per grid step.  Scaling and the final
    tiny reduction happen in the wrapper, keeping the hot loop to loads + adds.
    """
    in_refs = refs[:n_in]
    o_ref = refs[n_in]

    def accumulate(num_chunks, valid_rows, unroll_steps):
        def body(k, accs):
            idx = pl.multiple_of(k * CHUNK_ROWS, CHUNK_ROWS)
            new_accs = []
            for r, acc in zip(in_refs, accs):
                v = r[pl.ds(idx, CHUNK_ROWS), :].astype(jnp.float32)
                if valid_rows is not None:
                    # Row-granular mask for the ragged tail block only.  The
                    # invalid rows of the VMEM buffer hold stale data; the
                    # select discards them before they touch the accumulator.
                    ridx = idx + lax.broadcasted_iota(
                        jnp.int32, (CHUNK_ROWS, LANES), 0)
                    v = jnp.where(ridx < valid_rows, v, 0.0)
                new_accs.append(acc + v)
            return tuple(new_accs)

        init = tuple(jnp.zeros((CHUNK_ROWS, LANES), jnp.float32)
                     for _ in range(n_in))
        accs = lax.fori_loop(0, num_chunks, body, init, unroll=unroll_steps)
        for j, acc in enumerate(accs):
            # Layout-preserving collapse (CHUNK_ROWS,128) -> (8,128): vector adds.
            o_ref[0, j] = acc.reshape(CHUNK_ROWS // SUBLANES, SUBLANES,
                                      LANES).sum(axis=0)

    if tail_rows is None:
        accumulate(n_chunks, None, unroll)
    else:
        pid = pl.program_id(0)
        last = pl.num_programs(0) - 1

        @pl.when(pid < last)
        def _():
            accumulate(n_chunks, None, unroll)          # no mask on full blocks

        @pl.when(pid == last)
        def _():
            accumulate(tail_chunks, tail_rows, tail_unroll)


def _prep(x):
    """Flatten to (rows, 128) in the input's native dtype.

    Pads (with zeros) only when numel % 128 != 0, or when the array is tiny
    (< one chunk).  Padded zeros never perturb the sums since the means use
    the true element counts.
    """
    flat = x.reshape(-1)
    n = flat.shape[0]
    target = max(CHUNK_ROWS * LANES, _round_up(n, LANES))
    if target != n:
        # TODO(synk): a manual-DMA (memory_space=pl.ANY) tail path would avoid
        # this padded HBM copy for sizes that are not multiples of 128.
        flat = jnp.pad(flat, (0, target - n))
    return flat.reshape(-1, LANES)


def _streaming_sums(arrays):
    """f32 sums of each array in `arrays` (all with equal element count)."""
    n_in = len(arrays)
    mats = [_prep(a) for a in arrays]
    rows = mats[0].shape[0]
    assert all(m.shape[0] == rows for m in mats)

    itemsize = max(m.dtype.itemsize for m in mats)
    max_rows = max(CHUNK_ROWS,
                   _round_down(BLOCK_BYTES // (LANES * itemsize), CHUNK_ROWS))

    # Prefer >= 2 blocks (both v7x TensorCores) with an unroll-friendly tile,
    # never exceeding the array itself (partial blocks only at the tail).
    quantum = 8 * CHUNK_ROWS if rows >= 16 * CHUNK_ROWS else CHUNK_ROWS
    row_tile = min(max_rows,
                   _round_up(-(-rows // 2), quantum),
                   _round_down(rows, CHUNK_ROWS))
    row_tile = max(row_tile, CHUNK_ROWS)

    grid_len = -(-rows // row_tile)
    n_chunks = row_tile // CHUNK_ROWS
    tail_rows = rows - (grid_len - 1) * row_tile
    has_tail = tail_rows != row_tile
    tail_chunks = -(-tail_rows // CHUNK_ROWS)

    kernel = functools.partial(
        _partial_sums_kernel,
        n_in=n_in,
        n_chunks=n_chunks,
        unroll=_unroll_for(n_chunks),
        tail_rows=tail_rows if has_tail else None,
        tail_chunks=tail_chunks,
        tail_unroll=_unroll_for(tail_chunks),
    )

    partials = pl.pallas_call(
        kernel,
        out_shape=jax.ShapeDtypeStruct((grid_len, n_in, SUBLANES, LANES),
                                       jnp.float32),
        grid_spec=pltpu.PrefetchScalarGridSpec(
            num_scalar_prefetch=0,
            grid=(grid_len,),
            in_specs=[pl.BlockSpec((row_tile, LANES), lambda i: (i, 0))
                      for _ in range(n_in)],
            out_specs=pl.BlockSpec((1, n_in, SUBLANES, LANES),
                                   lambda i: (i, 0, 0, 0)),
        ),
        compiler_params=pltpu.CompilerParams(
            dimension_semantics=("parallel",),       # both TCs on v7x
            vmem_limit_bytes=32 * 1024 * 1024,       # safe on v5e/v6e/v7x
        ),
    )(*mats)

    # Tiny final reduction over per-block (8,128) partials.
    return jnp.sum(partials, axis=(0, 2, 3))


def criterion_adv(d_out_S, d_out_T, *, min_pallas_bytes=FAST_PATH_BYTES):
    """wgan-gp discriminator adversarial loss: -mean(d_out_T) + mean(d_out_S)."""
    # Mirrors the PyTorch assert (per-sample output dims of D must match).
    assert d_out_S[0].shape == d_out_T[0].shape, (
        "the output dim of D with teacher and student as input differ")

    n_s = float(d_out_S.size)
    n_t = float(d_out_T.size)

    total_bytes = (d_out_S.size * d_out_S.dtype.itemsize
                   + d_out_T.size * d_out_T.dtype.itemsize)
    if total_bytes < min_pallas_bytes:
        # Tiny inputs: the fused XLA reduction beats the custom-call overhead.
        return (jnp.sum(d_out_S.astype(jnp.float32)) / n_s
                - jnp.sum(d_out_T.astype(jnp.float32)) / n_t)

    if d_out_S.shape == d_out_T.shape:
        sums = _streaming_sums((d_out_S, d_out_T))
        sum_s, sum_t = sums[0], sums[1]
    else:
        sum_s = _streaming_sums((d_out_S,))[0]
        sum_t = _streaming_sums((d_out_T,))[0]

    # d_loss_real = -mean(T); d_loss_fake = mean(S)
    return sum_s / n_s - sum_t / n_t


if __name__ == "__main__":
    key = jax.random.PRNGKey(0)
    ks = jax.random.split(key, 8)

    def ref_loss(S, T):
        return (-jnp.mean(T.astype(jnp.float32))
                + jnp.mean(S.astype(jnp.float32)))

    # 1) Small NCHW discriminator outputs, forced through the Pallas path
    #    (single partial block + gated tail mask).
    S = jax.random.normal(ks[0], (2, 4, 16, 16), dtype=jnp.float32)
    T = jax.random.normal(ks[1], (2, 4, 16, 16), dtype=jnp.float32)
    out = jax.block_until_ready(criterion_adv(S, T, min_pallas_bytes=0))
    assert jnp.allclose(out, ref_loss(S, T), atol=1e-5, rtol=1e-5), (
        out, ref_loss(S, T))

    # 1b) Same inputs through the small-input fast path.
    out_fast = jax.block_until_ready(criterion_adv(S, T))
    assert jnp.allclose(out_fast, ref_loss(S, T), atol=1e-5, rtol=1e-5)

    # 2) Odd size (540000 elements, % 128 != 0): multi-block grid, ragged-tail
    #    masking on the last block only.
    S2 = jax.random.normal(ks[2], (2, 3, 300, 300), dtype=jnp.float32)
    T2 = jax.random.normal(ks[3], (2, 3, 300, 300), dtype=jnp.float32)
    out2 = jax.block_until_ready(criterion_adv(S2, T2))
    assert jnp.allclose(out2, ref_loss(S2, T2), atol=1e-5, rtol=1e-4), (
        out2, ref_loss(S2, T2))

    # 3) bf16 inputs: upcast happens per chunk inside the kernel.
    S3 = jax.random.normal(ks[4], (2, 4, 16, 16), dtype=jnp.bfloat16)
    T3 = jax.random.normal(ks[5], (2, 4, 16, 16), dtype=jnp.bfloat16)
    out3 = jax.block_until_ready(criterion_adv(S3, T3, min_pallas_bytes=0))
    assert jnp.allclose(out3, ref_loss(S3, T3), atol=1e-3, rtol=1e-3), (
        out3, ref_loss(S3, T3))

    # 4) Different batch sizes (allowed by the reference assert): independent
    #    single-input reductions with the same kernel body.
    S4 = jax.random.normal(ks[6], (3, 4, 16, 16), dtype=jnp.float32)
    T4 = jax.random.normal(ks[7], (2, 4, 16, 16), dtype=jnp.float32)
    out4 = jax.block_until_ready(criterion_adv(S4, T4, min_pallas_bytes=0))
    assert jnp.allclose(out4, ref_loss(S4, T4), atol=1e-5, rtol=1e-5), (
        out4, ref_loss(S4, T4))

    print("KERNEL_OK")
</pallas_src>

<mosaic_0001>
module attributes {stable_mosaic.version = 11 : i64} {
  func.func @_partial_sums_kernel(%arg0: i32, %arg1: memref<32x128xf32, #tpu.memory_space<vmem>>, %arg2: memref<32x128xf32, #tpu.memory_space<vmem>>, %arg3: memref<1x2x8x128xf32, #tpu.memory_space<vmem>>) attributes {dimension_semantics = [#tpu.dimension_semantics<parallel>], iteration_bounds = array<i64: 1>, scalar_prefetch = 0 : i64, scratch_operands = 0 : i64, tpu.core_type = #tpu.core_type<tc>, window_params = [{transform_indices = @transform_0, window_bounds = array<i64: 32, 128>}, {transform_indices = @transform_1, window_bounds = array<i64: 32, 128>}, {transform_indices = @transform_2, window_bounds = array<i64: 1, 2, 8, 128>}]} {
    %cst = arith.constant 0.000000e+00 : f32
    %0 = vector.broadcast %cst : f32 to vector<32x128xf32>
    %cst_0 = arith.constant 0.000000e+00 : f32
    %1 = vector.broadcast %cst_0 : f32 to vector<32x128xf32>
    %c0_i32 = arith.constant 0 : i32
    %c32_i32 = arith.constant 32 : i32
    %2 = arith.muli %c0_i32, %c32_i32 : i32
    %3 = tpu.assume_multiple %2, 32 : i32
    %4 = arith.index_cast %3 : i32 to index
    %c0 = arith.constant 0 : index
    %5 = vector.load %arg1[%4, %c0] : memref<32x128xf32, #tpu.memory_space<vmem>>, vector<32x128xf32>
    %6 = arith.addf %0, %5 : vector<32x128xf32>
    %7 = arith.index_cast %3 : i32 to index
    %c0_1 = arith.constant 0 : index
    %8 = vector.load %arg2[%7, %c0_1] : memref<32x128xf32, #tpu.memory_space<vmem>>, vector<32x128xf32>
    %9 = arith.addf %1, %8 : vector<32x128xf32>
    %c1_i32 = arith.constant 1 : i32
    %10 = vector.shape_cast %6 : vector<32x128xf32> to vector<4x8x128xf32>
    %cst_2 = arith.constant dense<0.000000e+00> : vector<8x128xf32>
    %11 = vector.multi_reduction <add>, %10, %cst_2 [0] : vector<4x8x128xf32> to vector<8x128xf32>
    %c0_3 = arith.constant 0 : index
    %c0_4 = arith.constant 0 : index
    %c0_5 = arith.constant 0 : index
    %c0_6 = arith.constant 0 : index
    %12 = vector.load %arg3[%c0_3, %c0_4, %c0_5, %c0_6] : memref<1x2x8x128xf32, #tpu.memory_space<vmem>>, vector<1x1x8x128xf32>
    %13 = vector.shape_cast %12 : vector<1x1x8x128xf32> to vector<8x128xf32>
    %14 = vector.shape_cast %11 : vector<8x128xf32> to vector<1x1x8x128xf32>
    tpu.vector_store %arg3[%c0_3, %c0_4, %c0_5, %c0_6], %14 {strides = array<i32>} : memref<1x2x8x128xf32, #tpu.memory_space<vmem>>, vector<1x1x8x128xf32>,
    %15 = vector.shape_cast %9 : vector<32x128xf32> to vector<4x8x128xf32>
    %cst_7 = arith.constant dense<0.000000e+00> : vector<8x128xf32>
    %16 = vector.multi_reduction <add>, %15, %cst_7 [0] : vector<4x8x128xf32> to vector<8x128xf32>
    %c0_8 = arith.constant 0 : index
    %c1 = arith.constant 1 : index
    %c0_9 = arith.constant 0 : index
    %c0_10 = arith.constant 0 : index
    %17 = vector.load %arg3[%c0_8, %c1, %c0_9, %c0_10] : memref<1x2x8x128xf32, #tpu.memory_space<vmem>>, vector<1x1x8x128xf32>
    %18 = vector.shape_cast %17 : vector<1x1x8x128xf32> to vector<8x128xf32>
    %19 = vector.shape_cast %16 : vector<8x128xf32> to vector<1x1x8x128xf32>
    tpu.vector_store %arg3[%c0_8, %c1, %c0_9, %c0_10], %19 {strides = array<i32>} : memref<1x2x8x128xf32, #tpu.memory_space<vmem>>, vector<1x1x8x128xf32>,
    return
  }
  func.func @transform_0(%arg0: i32) -> (i32, i32) {
    %c0_i32 = arith.constant 0 : i32
    %c0_i32_0 = arith.constant 0 : i32
    return %arg0, %c0_i32 : i32, i32
  }
  func.func @transform_1(%arg0: i32) -> (i32, i32) {
    %c0_i32 = arith.constant 0 : i32
    %c0_i32_0 = arith.constant 0 : i32
    return %arg0, %c0_i32 : i32, i32
  }
  func.func @transform_2(%arg0: i32) -> (i32, i32, i32, i32) {
    %c0_i32 = arith.constant 0 : i32
    %c0_i32_0 = arith.constant 0 : i32
    %c0_i32_1 = arith.constant 0 : i32
    %c0_i32_2 = arith.constant 0 : i32
    return %arg0, %c0_i32, %c0_i32_0, %c0_i32_1 : i32, i32, i32, i32
  }
}

</mosaic_0001>

<bundles_post_ra>
// kernel: tpu_custom_call.1
= control target key start
LH: loop header
LB: loop body
LE: loop exit
PB: predicated region body
PF: predicated region fallthrough
CT: control target
= control target key end

     0   :  { %7 = vsyncpa [#allocation3], 0  ;;  %s192_s0 = inlined_call_operand.hbm [shape: f32[32,128], index: 0, kind: input, shape index: {}]   ;;  %s193_s1 = inlined_call_operand.hbm [shape: f32[32,128], index: 1, kind: input, shape index: {}]   ;;  %s194_s2 = inlined_call_operand.hbm [shape: f32[1,2,8,128], index: 2, kind: output, shape index: {}]  }
   0x1   :  { %8 = vsyncpa [#allocation6], 0 }
   0x2   :  { %9 = vsyncpa [#allocation4], 0  ;;  %s154_s9 = smov [#allocation2]  }
   0x3   :  { %s15_s10 = sshll.u32 %s154_s9, 4  ;;  %s16_s10 = int_to_ptr.vmem [resolvable:$true] %s15_s10 }
   0x4   :  { %s96_s11 = scalar_lea.vmem %s16_s10, 512  ;;  %p101_p1 = scmp.lt.s32.totalorder %s16_s10, %s16_s10 }
   0x5   :  { %p97_p0 = scmp.ne.s32.totalorder %s16_s10, %s96_s11  ;;  %p102_p2 = scmp.lt.s32.totalorder %s96_s11, %s96_s11 }
   0x7   :  { %p103_p3 = por %p102_p2, %p101_p1 }
   0x9   :  { %p104_p4 = pnand %p103_p3, %p97_p0 }
   0xb   :  { %107 = shalt.err (!%p104_p4)
}
   0xc   :  { %s155_s12 = smov 128   ;;  %s156_s13 = smov 8  }
   0xd   :  { %21 = dma.hbm_to_vmem [thread:$0]  %s192_s0, 512, %s16_s10, [#allocation3], %s155_s12, %s155_s12, %s156_s13  }
   0xe   :  { %s157_s16 = smov [#allocation5]  }
   0xf   :  { %s27_s17 = sshll.u32 %s157_s16, 4  ;;  %s28_s17 = int_to_ptr.vmem [resolvable:$true] %s27_s17 }
  0x10   :  { %s116_s18 = scalar_lea.vmem %s28_s17, 512  ;;  %p121_p6 = scmp.lt.s32.totalorder %s28_s17, %s28_s17 }
  0x11   :  { %p117_p5 = scmp.ne.s32.totalorder %s28_s17, %s116_s18  ;;  %p122_p7 = scmp.lt.s32.totalorder %s116_s18, %s116_s18 }
  0x13   :  { %p123_p8 = por %p122_p7, %p121_p6 }
  0x15   :  { %p124_p9 = pnand %p123_p8, %p117_p5 }
  0x17   :  { %127 = shalt.err (!%p124_p9)
}
  0x18   :  { %33 = dma.hbm_to_vmem [thread:$0]  %s193_s1, 512, %s28_s17, [#allocation6], %s155_s12, %s155_s12, %s156_s13  }
  0x19   :  { %148 = dma.done.wait [#allocation3], 512  }
  0x1a   :  { %149 = vsyncadd [#allocation3], 4294966784 }
  0x1b   :  { %150 = dma.done.wait [#allocation6], 512  }
  0x1c   :  { %151 = vsyncadd [#allocation6], 4294966784  ;;  %v40_v0 = vld [vmem:[#allocation2] sm:$0xff]  ;;  %v41_v1 = vld [vmem:[#allocation2 + $0x8] sm:$0xff]  ;;  %s158_s0 = smov [#allocation7]  }
  0x1d   :  { %v42_v2 = vld [vmem:[#allocation2 + $0x10] sm:$0xff]  ;;  %v56_v3 = vadd.f32 %v41_v1, %v40_v0  ;;  %v48_v4 = vld [vmem:[#allocation5] sm:$0xff]  ;;  %v49_v5 = vld [vmem:[#allocation5 + $0x8] sm:$0xff]  ;;  %s70_s21 = sshll.u32 %s158_s0, 4  ;;  %s71_s21 = int_to_ptr.vmem [resolvable:$true] %s70_s21 }
  0x1e   :  { %v43_v6 = vld [vmem:[#allocation2 + $0x18] sm:$0xff]  ;;  %v50_v7 = vld [vmem:[#allocation5 + $0x10] sm:$0xff]  ;;  %v60_v8 = vadd.f32 %v49_v5, %v48_v4  ;;  %s128_s1 = scalar_lea.vmem %s71_s21, 256  ;;  %p133_p11 = scmp.lt.s32.totalorder %s71_s21, %s71_s21 }
  0x1f   :  { %v57_v9 = vadd.f32 %v56_v3, %v42_v2  ;;  %v51_v10 = vld [vmem:[#allocation5 + $0x18] sm:$0xff]  ;;  %p129_p10 = scmp.ne.s32.totalorder %s71_s21, %s128_s1  ;;  %p134_p12 = scmp.lt.s32.totalorder %s128_s1, %s128_s1 }
  0x20   :  { %v61_v11 = vadd.f32 %v60_v8, %v50_v7 }
  0x21   :  { %v58_v12 = vadd.f32 %v57_v9, %v43_v6  ;;  %p135_p13 = por %p134_p12, %p133_p11 }
  0x22   :  { %v62_v13 = vadd.f32 %v61_v11, %v51_v10 }
  0x23   :  { %59 = vst [vmem:[#allocation7] sm:$0xff] %v58_v12  ;;  %p136_p0 = pnand %p135_p13, %p129_p10 }
  0x24   :  { %64 = vst [vmem:[#allocation7 + $0x8] sm:$0xff] %v62_v13 }
  0x25   :  { %139 = shalt.err (!%p136_p0)
}
  0x26   :  { %76 = dma.vmem_to_hbm [thread:$0]  %s71_s21, 256, %s194_s2, [#allocation4], %s155_s12, %s155_s12, %s156_s13  }
  0x27   :  { %152 = dma.done.wait [#allocation4], 256  }
  0x28   :  { %153 = vsyncadd [#allocation4], 4294967040 }
  0x29   :  { %80 = vsyncpa [#allocation3], 1 }
  0x2a   :  { %81 = vsyncpa [#allocation6], 1 }
  0x2b   :  { %82 = vsyncpa [#allocation4], 1 }

</bundles_post_ra>
